<compile_context>
chip_gen: v6e
topology: v6e:2x2x1
jax: 0.10.0
libtpu: 0.0.40
codegen_flags: <defaults>
</compile_context>

<pallas_src>
from math import gcd

import jax
import jax.numpy as jnp
from jax.experimental import pallas as pl
from jax.experimental.pallas import tpu as pltpu

# CIFAR-style constants from the reference module.
MEAN = [x / 255 for x in [129.3, 124.1, 112.4]]
STD = [x / 255 for x in [68.2, 65.4, 70.4]]


def _normalize_kernel(x_ref, scale_ref, bias_ref, o_ref):
    # x_ref / o_ref: (bn, HW) tile.  scale_ref / bias_ref: (bn, 1) f32 columns
    # that broadcast along the lane axis.  One VPU multiply-add per element.
    x = x_ref[...].astype(jnp.float32)
    o_ref[...] = (x * scale_ref[...] + bias_ref[...]).astype(o_ref.dtype)


def _vmem_capacity_bytes():
    try:
        return int(pltpu.get_tpu_info().vmem_capacity_bytes)
    except Exception:
        return 64 * 1024 * 1024  # conservative (v7x-sized) fallback


def normalize_layer(x, mean, std, *, target_block_bytes=None):
    """x: (N, C, H, W); mean, std: (C, 1, 1). Returns (x - mean) / std."""
    N, C, H, W = x.shape
    assert mean.shape == (C, 1, 1) and std.shape == (C, 1, 1)
    HW = H * W
    R = N * C  # always a multiple of C

    # Per-channel scale/bias, computed and kept in f32 regardless of x.dtype.
    mean_f = mean.reshape(C).astype(jnp.float32)
    std_f = std.reshape(C).astype(jnp.float32)
    scale_c = 1.0 / std_f
    bias_c = -mean_f * scale_c

    # ---- Generation-aware budgets -------------------------------------------
    vmem_cap = _vmem_capacity_bytes()
    if target_block_bytes is None:
        if vmem_cap >= 100 * 1024 * 1024:        # v5e / v6e: 128 MiB VMEM
            target_block_bytes = 8 * 1024 * 1024
        else:                                    # v7x: 64 MiB VMEM per TC
            target_block_bytes = 4 * 1024 * 1024
    vmem_limit = min(vmem_cap // 2, 64 * 1024 * 1024)

    # ---- Row-block sizing ----------------------------------------------------
    itemsize = jnp.dtype(x.dtype).itemsize
    pack = max(8, 32 // itemsize)                # sublane packing: 8 f32, 16 bf16, 32 i8
    multiple = C * pack // gcd(C, pack)          # keeps per-tile channel pattern static

    # VMEM per row, double-buffered: 2 x-bufs + 2 out-bufs, plus the two (bn,1)
    # f32 riders (lane-padded to 128) x 2 bufs.  Keeping riders in the budget
    # auto-clamps bn when HW is small.
    per_row_tiles = 4 * HW * itemsize
    per_row_riders = 2 * 2 * 128 * 4
    rows_budget = (4 * target_block_bytes) // (per_row_tiles + per_row_riders)
    rows_budget = max(multiple, (rows_budget // multiple) * multiple)

    # Guarantee >= 2 grid steps when possible so the "parallel" axis can shard
    # across v7x's two TensorCores (harmless on single-TC v5e/v6e).
    half_rows = max(multiple, (pl.cdiv(R, 2) // multiple) * multiple)
    bn = min(rows_budget, half_rows)
    if bn >= R:
        bn = R                                   # single step; R is still a multiple of C
    grid = (pl.cdiv(R, bn),)

    # bn is a multiple of C (either a multiple of lcm(C, pack) or bn == R = N*C),
    # so one bn-row rider covers every tile: row j of any tile is channel j % C.
    reps = bn // C
    scale = jnp.tile(scale_c, reps).reshape(bn, 1)
    bias = jnp.tile(bias_c, reps).reshape(bn, 1)

    x2 = x.reshape(R, HW)  # free reshape: lane-dense last dim

    out2 = pl.pallas_call(
        _normalize_kernel,
        out_shape=jax.ShapeDtypeStruct((R, HW), x.dtype),
        grid_spec=pltpu.PrefetchScalarGridSpec(
            num_scalar_prefetch=0,
            grid=grid,
            in_specs=[
                pl.BlockSpec((bn, HW), lambda i: (i, 0)),
                pl.BlockSpec((bn, 1), lambda i: (0, 0)),   # constant block: DMA'd once
                pl.BlockSpec((bn, 1), lambda i: (0, 0)),   # constant block: DMA'd once
            ],
            out_specs=pl.BlockSpec((bn, HW), lambda i: (i, 0)),
        ),
        compiler_params=pltpu.CompilerParams(
            dimension_semantics=("parallel",),
            vmem_limit_bytes=vmem_limit,
        ),
    )(x2, scale, bias)

    return out2.reshape(N, C, H, W)


if __name__ == "__main__":
    key = jax.random.PRNGKey(0)

    # Deterministic parameter init, matching
    # nn.Parameter(torch.Tensor(mean).unsqueeze(1).unsqueeze(1)).
    C = 3
    mean = jnp.asarray(MEAN, dtype=jnp.float32).reshape(C, 1, 1)
    std = jnp.asarray(STD, dtype=jnp.float32).reshape(C, 1, 1)

    # Primary small shape (single-step grid path).
    N, H, W = 2, 16, 16
    x = jax.random.normal(key, (N, C, H, W), dtype=jnp.float32)
    out = jax.block_until_ready(normalize_layer(x, mean, std))
    ref = (x - mean[None, :, :, :]) / std[None, :, :, :]
    assert out.shape == (N, C, H, W)
    assert jnp.allclose(out, ref, rtol=1e-5, atol=1e-5)

    # Multi-step grid path (partial last tile + repeated rider pattern).
    key2 = jax.random.PRNGKey(0)
    N2, H2, W2 = 9, 8, 16
    x2 = jax.random.normal(key2, (N2, C, H2, W2), dtype=jnp.float32)
    out2 = jax.block_until_ready(normalize_layer(x2, mean, std))
    ref2 = (x2 - mean[None, :, :, :]) / std[None, :, :, :]
    assert jnp.allclose(out2, ref2, rtol=1e-5, atol=1e-5)

    print("KERNEL_OK")
</pallas_src>

<mosaic_0001>
module attributes {stable_mosaic.version = 11 : i64} {
  func.func @_normalize_kernel(%arg0: i32, %arg1: memref<6x256xf32, #tpu.memory_space<vmem>>, %arg2: memref<6x1xf32, #tpu.memory_space<vmem>>, %arg3: memref<6x1xf32, #tpu.memory_space<vmem>>, %arg4: memref<6x256xf32, #tpu.memory_space<vmem>>) attributes {dimension_semantics = [#tpu.dimension_semantics<parallel>], iteration_bounds = array<i64: 1>, scalar_prefetch = 0 : i64, scratch_operands = 0 : i64, tpu.core_type = #tpu.core_type<tc>, window_params = [{transform_indices = @transform_0, window_bounds = array<i64: 6, 256>}, {pipeline_mode = #tpu.pipeline_mode<synchronous>, transform_indices = @transform_1, window_bounds = array<i64: 6, 1>}, {pipeline_mode = #tpu.pipeline_mode<synchronous>, transform_indices = @transform_2, window_bounds = array<i64: 6, 1>}, {transform_indices = @transform_3, window_bounds = array<i64: 6, 256>}]} {
    %c0 = arith.constant 0 : index
    %c0_0 = arith.constant 0 : index
    %0 = vector.load %arg1[%c0, %c0_0] : memref<6x256xf32, #tpu.memory_space<vmem>>, vector<6x256xf32>
    %c0_1 = arith.constant 0 : index
    %c0_2 = arith.constant 0 : index
    %1 = vector.load %arg2[%c0_1, %c0_2] : memref<6x1xf32, #tpu.memory_space<vmem>>, vector<6x1xf32>
    %2 = vector.broadcast %1 : vector<6x1xf32> to vector<6x256xf32>
    %3 = arith.mulf %0, %2 : vector<6x256xf32>
    %c0_3 = arith.constant 0 : index
    %c0_4 = arith.constant 0 : index
    %4 = vector.load %arg3[%c0_3, %c0_4] : memref<6x1xf32, #tpu.memory_space<vmem>>, vector<6x1xf32>
    %5 = vector.broadcast %4 : vector<6x1xf32> to vector<6x256xf32>
    %6 = arith.addf %3, %5 : vector<6x256xf32>
    %c0_5 = arith.constant 0 : index
    %c0_6 = arith.constant 0 : index
    %7 = vector.load %arg4[%c0_5, %c0_6] : memref<6x256xf32, #tpu.memory_space<vmem>>, vector<6x256xf32>
    tpu.vector_store %arg4[%c0_5, %c0_6], %6 {strides = array<i32>} : memref<6x256xf32, #tpu.memory_space<vmem>>, vector<6x256xf32>,
    return
  }
  func.func @transform_0(%arg0: i32) -> (i32, i32) {
    %c0_i32 = arith.constant 0 : i32
    %c0_i32_0 = arith.constant 0 : i32
    return %arg0, %c0_i32 : i32, i32
  }
  func.func @transform_1(%arg0: i32) -> (i32, i32) {
    %c0_i32 = arith.constant 0 : i32
    %c0_i32_0 = arith.constant 0 : i32
    %c0_i32_1 = arith.constant 0 : i32
    return %c0_i32, %c0_i32_0 : i32, i32
  }
  func.func @transform_2(%arg0: i32) -> (i32, i32) {
    %c0_i32 = arith.constant 0 : i32
    %c0_i32_0 = arith.constant 0 : i32
    %c0_i32_1 = arith.constant 0 : i32
    return %c0_i32, %c0_i32_0 : i32, i32
  }
  func.func @transform_3(%arg0: i32) -> (i32, i32) {
    %c0_i32 = arith.constant 0 : i32
    %c0_i32_0 = arith.constant 0 : i32
    return %arg0, %c0_i32 : i32, i32
  }
}

</mosaic_0001>

<bundles_post_ra>
// kernel: tpu_custom_call.1
= control target key start
LH: loop header
LB: loop body
LE: loop exit
PB: predicated region body
PF: predicated region fallthrough
CT: control target
= control target key end

     0   :  { %v74_v1 = vmov 0   ;;  %s111_s0 = inlined_call_operand.vmem [shape: f32[6,256], index: 0, kind: input, shape index: {}]   ;;  %s112_s1 = inlined_call_operand.vmem [shape: f32[6,1], index: 1, kind: input, shape index: {}]   ;;  %s113_s2 = inlined_call_operand.vmem [shape: f32[6,1], index: 2, kind: input, shape index: {}]   ;;  %s114_s3 = inlined_call_operand.hbm [shape: f32[6,256], index: 3, kind: output, shape index: {}]  }
   0x1   :  { %v17_v0 = vld [vmem:[%s112_s1] sm:$0x3f]  ;;  %51 = vset.pattern.permute.xlu0 %v74_v1 }
   0x2   :  { %8 = vsyncpa [#allocation3], 0  ;;  %20 = vperm.xlu0 %51, %v17_v0   ;;  %v25_v2 = vld [vmem:[%s113_s2] sm:$0x3f]  ;;  %v16_v5 = vld [vmem:[%s111_s0 + $0x8] sm:$0x3f] }
   0x3   :  { %v15_v4 = vld [vmem:[%s111_s0] sm:$0x3f]  ;;  %s75_s20 = smov [#allocation2]  }
   0x4   :  { %s41_s1 = sshll.u32 %s75_s20, 4  ;;  %s42_s1 = int_to_ptr.vmem [resolvable:$true] %s41_s1 }
   0x5   :  { %s52_s2 = scalar_lea.vmem %s42_s1, 256  ;;  %p57_p1 = scmp.lt.s32.totalorder %s42_s1, %s42_s1 }
   0x6   :  { %28 = vperm.xlu0 %51, %v25_v2   ;;  %p53_p0 = scmp.ne.s32.totalorder %s42_s1, %s52_s2  ;;  %p58_p2 = scmp.lt.s32.totalorder %s52_s2, %s52_s2 }
   0x8   :  { %p59_p3 = por %p58_p2, %p57_p1 }
   0xa   :  { %p60_p4 = pnand %p59_p3, %p53_p0 }
  0x7d   :  { %v21_v3 = vpop.permute.xlu0 %20 }
  0x7e   :  { %v23_v6 = vmul.f32 %v21_v3, %v15_v4  ;;  %v24_v7 = vmul.f32 %v21_v3, %v16_v5 }
  0x81   :  { %v29_v8 = vpop.permute.xlu0 %28 }
  0x82   :  { %v31_v9 = vadd.f32 %v29_v8, %v23_v6  ;;  %v32_v10 = vadd.f32 %v29_v8, %v24_v7 }
  0x84   :  { %33 = vst [vmem:[#allocation2] sm:$0x3f] %v31_v9  ;;  %34 = vst [vmem:[#allocation2 + $0x8] sm:$0x3f] %v32_v10 }
  0x85   :  { %63 = shalt.err (!%p60_p4)
}
  0x86   :  { %44 = dma.vmem_to_hbm [thread:$0]  %s42_s1, 256, %s114_s3, [#allocation3]  }
  0x87   :  { %72 = dma.done.wait [#allocation3], 256  }
  0x88   :  { %73 = vsyncadd [#allocation3], 4294967040 }
  0x89   :  { %48 = vsyncpa [#allocation3], 1 }

</bundles_post_ra>
